<compile_context>
chip_gen: v5e
topology: v5e:2x2
jax: 0.10.0
libtpu: 0.0.40
codegen_flags: <defaults>
</compile_context>

<pallas_src>
import jax
import jax.numpy as jnp
from jax import lax
from jax.experimental import pallas as pl
from jax.experimental.pallas import tpu as pltpu


def _mlp_kernel(x_ref, w12t_ref, b12_ref, w34_ref, b34_ref, o_ref):
    # x_ref:    (TB, in_dim)  -- activations in natural layout, streamed
    # w12t_ref: (32, in_dim)  -- fused (linear1 o linear2) weight, transposed
    # b12_ref:  (32, 1)
    # w34_ref:  (32, 1)       -- fused (linear3 o linear4) weight (out_dim==1)
    # b34_ref:  (1, 1)
    # o_ref:    (1, TB)       -- lane-dense output slab
    #
    # Fused linear1+linear2 on the MXU, contracting against x's LAST dim so
    # the intermediate is (32, TB): batch sits on the 128-lane axis.
    h = lax.dot_general(
        w12t_ref[...], x_ref[...],
        dimension_numbers=(((1,), (1,)), ((), ())),
        preferred_element_type=jnp.float32)              # (32, TB)
    h = jnp.maximum(h + b12_ref[...], 0.0)               # bias + relu (VPU)
    # Fused linear3+linear4 (output dim == 1): VPU multiply + sublane reduce
    # instead of wasting an MXU push on an N=1 matmul.
    z = jnp.sum(h * w34_ref[...], axis=0, keepdims=True) + b34_ref[...]  # (1, TB)
    # Sigmoid: exp on the EUP; exact divide keeps the 1e-5 tolerance.
    o_ref[...] = (1.0 / (1.0 + jnp.exp(-z))).astype(o_ref.dtype)


def fuse_params(params):
    """Fuse the back-to-back linear pairs once, in f32 (outside the kernel).

    Input params follow the (in, out) weight convention (x @ W + b).
    Returns kernel-layout tensors:
      w12t: (32, in_dim), b12: (32, 1), w34: (32, out_dim), b34: (1, out_dim)
    """
    w1, b1, w2, b2, w3, b3, w4, b4 = params
    w12 = w1 @ w2                  # (in, 32)
    b12 = b1 @ w2 + b2             # (1, 32)
    w34 = w3 @ w4                  # (32, out)
    b34 = b3 @ w4 + b4             # (1, out)
    return (w12.T, b12.T, w34, b34)


def _round_up(v, m):
    return ((v + m - 1) // m) * m


def mlp_forward(x, fused):
    """x: (B, in_dim) float32 -> (B, 1) sigmoid probabilities."""
    w12t, b12, w34, b34 = fused
    B, in_dim = x.shape
    out_dim = w34.shape[1]
    assert out_dim == 1, "VPU final-projection path assumes output_dim == 1"

    # Batch-tile selection:
    #  * small B: one tile, rounded up to the 8-sublane granule (ragged rows
    #    are read as garbage and sliced off after the kernel).
    #  * larger B: big tiles (amortize the ~0.35us per-step overhead) but at
    #    least 2 tiles so both v7x TensorCores get work on the parallel axis.
    MAX_TB = 8192
    if B < 512:
        TB = _round_up(B, 8)
    else:
        TB = min(MAX_TB, _round_up(pl.cdiv(B, 2), 128))
    n_tiles = pl.cdiv(B, TB)
    out_cols = n_tiles * TB

    out_t = pl.pallas_call(
        _mlp_kernel,
        out_shape=jax.ShapeDtypeStruct((1, out_cols), jnp.float32),
        grid=(n_tiles,),
        in_specs=[
            # streamed: one (TB, in_dim) slab of activations per grid step,
            # in x's natural layout (no wrapper transpose / pad).
            pl.BlockSpec((TB, in_dim), lambda i: (i, 0)),
            # weights / biases: constant block index -> resident in VMEM
            pl.BlockSpec(w12t.shape, lambda i: (0, 0)),
            pl.BlockSpec(b12.shape, lambda i: (0, 0)),
            pl.BlockSpec(w34.shape, lambda i: (0, 0)),
            pl.BlockSpec(b34.shape, lambda i: (0, 0)),
        ],
        out_specs=pl.BlockSpec((1, TB), lambda i: (0, i)),
        compiler_params=pltpu.CompilerParams(
            dimension_semantics=("parallel",)),
    )(x.astype(jnp.float32), w12t, b12, w34, b34)

    # Metadata-only reshape + slice (no transpose copy).
    return out_t.reshape(-1)[:B].reshape(B, 1)


def init_params(key, input_dim, output_dim):
    """Deterministic init matching nn.Linear's default U(-1/sqrt(fan_in), ...).
    Weights stored transposed relative to PyTorch: shape (in, out)."""
    dims = [(input_dim, 32), (32, 32), (32, 16), (16, output_dim)]
    params = []
    for (fan_in, fan_out) in dims:
        key, kw, kb = jax.random.split(key, 3)
        bound = 1.0 / jnp.sqrt(float(fan_in))
        w = jax.random.uniform(kw, (fan_in, fan_out), jnp.float32, -bound, bound)
        b = jax.random.uniform(kb, (1, fan_out), jnp.float32, -bound, bound)
        params.extend([w, b])
    return tuple(params)


def reference_forward(x, params):
    """Unfused reference identical to the PyTorch module's forward."""
    w1, b1, w2, b2, w3, b3, w4, b4 = params
    h = x @ w1 + b1
    h = h @ w2 + b2
    h = jnp.maximum(h, 0.0)
    h = h @ w3 + b3
    h = h @ w4 + b4
    return jax.nn.sigmoid(h)


if __name__ == "__main__":
    # Breast-cancer dataset geometry: 30 input features, 1 output probability.
    input_dim, output_dim = 30, 1
    batch = 8

    key = jax.random.PRNGKey(0)
    key, kx = jax.random.split(key)
    x = jax.random.normal(kx, (batch, input_dim), jnp.float32)
    params = init_params(key, input_dim, output_dim)

    fused = fuse_params(params)          # done once, outside the kernel
    out = jax.block_until_ready(mlp_forward(x, fused))
    ref = reference_forward(x, params)
    assert out.shape == (batch, output_dim)
    assert jnp.allclose(out, ref, atol=1e-5, rtol=1e-5)

    # Exercise the multi-tile path with a ragged last block (n_tiles = 2).
    key, kx2 = jax.random.split(key)
    x2 = jax.random.normal(kx2, (600, input_dim), jnp.float32)
    out2 = jax.block_until_ready(mlp_forward(x2, fused))
    ref2 = reference_forward(x2, params)
    assert out2.shape == (600, output_dim)
    assert jnp.allclose(out2, ref2, atol=1e-5, rtol=1e-5)

    print("KERNEL_OK")
</pallas_src>

<mosaic_0001>
module attributes {stable_mosaic.version = 11 : i64} {
  func.func @_mlp_kernel(%arg0: i32, %arg1: memref<8x30xf32, #tpu.memory_space<vmem>>, %arg2: memref<32x30xf32, #tpu.memory_space<vmem>>, %arg3: memref<32x1xf32, #tpu.memory_space<vmem>>, %arg4: memref<32x1xf32, #tpu.memory_space<vmem>>, %arg5: memref<1x1xf32, #tpu.memory_space<vmem>>, %arg6: memref<1x8xf32, #tpu.memory_space<vmem>>) attributes {dimension_semantics = [#tpu.dimension_semantics<parallel>], iteration_bounds = array<i64: 1>, scalar_prefetch = 0 : i64, scratch_operands = 0 : i64, tpu.core_type = #tpu.core_type<tc>, window_params = [{transform_indices = @transform_0, window_bounds = array<i64: 8, 30>}, {pipeline_mode = #tpu.pipeline_mode<synchronous>, transform_indices = @transform_1, window_bounds = array<i64: 32, 30>}, {pipeline_mode = #tpu.pipeline_mode<synchronous>, transform_indices = @transform_2, window_bounds = array<i64: 32, 1>}, {pipeline_mode = #tpu.pipeline_mode<synchronous>, transform_indices = @transform_3, window_bounds = array<i64: 32, 1>}, {pipeline_mode = #tpu.pipeline_mode<synchronous>, transform_indices = @transform_4, window_bounds = array<i64: 1, 1>}, {transform_indices = @transform_5, window_bounds = array<i64: 1, 8>}]} {
    %c0 = arith.constant 0 : index
    %c0_0 = arith.constant 0 : index
    %0 = vector.load %arg2[%c0, %c0_0] : memref<32x30xf32, #tpu.memory_space<vmem>>, vector<32x30xf32>
    %c0_1 = arith.constant 0 : index
    %c0_2 = arith.constant 0 : index
    %1 = vector.load %arg1[%c0_1, %c0_2] : memref<8x30xf32, #tpu.memory_space<vmem>>, vector<8x30xf32>
    %cst = arith.constant dense<0.000000e+00> : vector<32x8xf32>
    %2 = tpu.matmul %0, %1, %cst {dimension_numbers = #tpu.dot_dimension_numbers<[1], [1], [0], [0], [0, 0, 1, 0], [], []>} : vector<32x30xf32>, vector<8x30xf32>, vector<32x8xf32> -> vector<32x8xf32>
    %c0_3 = arith.constant 0 : index
    %c0_4 = arith.constant 0 : index
    %3 = vector.load %arg3[%c0_3, %c0_4] : memref<32x1xf32, #tpu.memory_space<vmem>>, vector<32x1xf32>
    %4 = vector.broadcast %3 : vector<32x1xf32> to vector<32x8xf32>
    %5 = arith.addf %2, %4 : vector<32x8xf32>
    %cst_5 = arith.constant 0.000000e+00 : f32
    %6 = vector.broadcast %cst_5 : f32 to vector<32x8xf32>
    %7 = arith.maximumf %5, %6 : vector<32x8xf32>
    %c0_6 = arith.constant 0 : index
    %c0_7 = arith.constant 0 : index
    %8 = vector.load %arg4[%c0_6, %c0_7] : memref<32x1xf32, #tpu.memory_space<vmem>>, vector<32x1xf32>
    %9 = vector.broadcast %8 : vector<32x1xf32> to vector<32x8xf32>
    %10 = arith.mulf %7, %9 : vector<32x8xf32>
    %cst_8 = arith.constant dense<0.000000e+00> : vector<8xf32>
    %11 = vector.multi_reduction <add>, %10, %cst_8 [0] : vector<32x8xf32> to vector<8xf32>
    %12 = vector.shape_cast %11 : vector<8xf32> to vector<1x8xf32>
    %c0_9 = arith.constant 0 : index
    %c0_10 = arith.constant 0 : index
    %13 = vector.load %arg5[%c0_9, %c0_10] : memref<1x1xf32, #tpu.memory_space<vmem>>, vector<1x1xf32>
    %14 = vector.broadcast %13 : vector<1x1xf32> to vector<1x8xf32>
    %15 = arith.addf %12, %14 : vector<1x8xf32>
    %cst_11 = arith.constant 0.000000e+00 : f32
    %16 = vector.broadcast %cst_11 : f32 to vector<1x8xf32>
    %17 = arith.subf %16, %15 : vector<1x8xf32>
    %18 = math.exp %17 : vector<1x8xf32>
    %cst_12 = arith.constant 1.000000e+00 : f32
    %19 = vector.broadcast %cst_12 : f32 to vector<1x8xf32>
    %20 = arith.addf %19, %18 : vector<1x8xf32>
    %cst_13 = arith.constant 1.000000e+00 : f32
    %21 = vector.broadcast %cst_13 : f32 to vector<1x8xf32>
    %22 = arith.divf %21, %20 : vector<1x8xf32>
    %c0_14 = arith.constant 0 : index
    %c0_15 = arith.constant 0 : index
    %23 = vector.load %arg6[%c0_14, %c0_15] : memref<1x8xf32, #tpu.memory_space<vmem>>, vector<1x8xf32>
    tpu.vector_store %arg6[%c0_14, %c0_15], %22 {strides = array<i32>} : memref<1x8xf32, #tpu.memory_space<vmem>>, vector<1x8xf32>,
    return
  }
  func.func @transform_0(%arg0: i32) -> (i32, i32) {
    %c0_i32 = arith.constant 0 : i32
    %c0_i32_0 = arith.constant 0 : i32
    return %arg0, %c0_i32 : i32, i32
  }
  func.func @transform_1(%arg0: i32) -> (i32, i32) {
    %c0_i32 = arith.constant 0 : i32
    %c0_i32_0 = arith.constant 0 : i32
    %c0_i32_1 = arith.constant 0 : i32
    return %c0_i32, %c0_i32_0 : i32, i32
  }
  func.func @transform_2(%arg0: i32) -> (i32, i32) {
    %c0_i32 = arith.constant 0 : i32
    %c0_i32_0 = arith.constant 0 : i32
    %c0_i32_1 = arith.constant 0 : i32
    return %c0_i32, %c0_i32_0 : i32, i32
  }
  func.func @transform_3(%arg0: i32) -> (i32, i32) {
    %c0_i32 = arith.constant 0 : i32
    %c0_i32_0 = arith.constant 0 : i32
    %c0_i32_1 = arith.constant 0 : i32
    return %c0_i32, %c0_i32_0 : i32, i32
  }
  func.func @transform_4(%arg0: i32) -> (i32, i32) {
    %c0_i32 = arith.constant 0 : i32
    %c0_i32_0 = arith.constant 0 : i32
    %c0_i32_1 = arith.constant 0 : i32
    return %c0_i32, %c0_i32_0 : i32, i32
  }
  func.func @transform_5(%arg0: i32) -> (i32, i32) {
    %c0_i32 = arith.constant 0 : i32
    %c0_i32_0 = arith.constant 0 : i32
    return %c0_i32, %arg0 : i32, i32
  }
}

</mosaic_0001>

<bundles_post_ra>
// kernel: tpu_custom_call.1
= control target key start
LH: loop header
LB: loop body
LE: loop exit
PB: predicated region body
PF: predicated region fallthrough
CT: control target
= control target key end

     0   :  { %s320_s0 = inlined_call_operand.vmem [shape: f32[8,30], index: 0, kind: input, shape index: {}]   ;;  %s321_s1 = inlined_call_operand.vmem [shape: f32[32,30], index: 1, kind: input, shape index: {}]   ;;  %s322_s2 = inlined_call_operand.vmem [shape: f32[32,1], index: 2, kind: input, shape index: {}]   ;;  %s323_s3 = inlined_call_operand.vmem [shape: f32[32,1], index: 3, kind: input, shape index: {}]   ;;  %s324_s4 = inlined_call_operand.<no memory space> [shape: f32[1,1], index: 4, kind: input, shape index: {}]   ;;  %s325_s5 = inlined_call_operand.hbm [shape: f32[1,8], index: 5, kind: output, shape index: {}]  }
   0x1   :  { %v10_v0 = vstv %s324_s4 }
   0x2   :  { %11 = vst [vmem:[#allocation2] sm:$0x1] %v10_v0 }
   0x3   :  { %v27_v1 = vld [vmem:[%s320_s0] sm:$0xff]  ;;  %vm52_vm0 = vcmask 244736   ;;  %v231_v2 = vmov 0   ;;  %v30_v3 = vld [vmem:[%s322_s2 + $0x10] sm:$0xff]  ;;  %v24_v6 = vld [vmem:[%s321_s1 + $0x8] sm:$0xff] }
   0x4   :  { %199 = vset.pattern.permute.xlu1 %v231_v2  ;;  %198 = vset.pattern.permute.xlu0 %v231_v2  ;;  %v28_v4 = vld [vmem:[%s322_s2] sm:$0xff]  ;;  %v25_v7 = vld [vmem:[%s321_s1 + $0x10] sm:$0xff]  ;;  %v26_v8 = vld [vmem:[%s321_s1 + $0x18] sm:$0xff] }
   0x5   :  { %188 = vmatpush.xpose.msk.msra.mxu0 %vm52_vm0, %v27_v1  ;;  %193 = vmatpush.xpose.msk.msra.mxu1 %vm52_vm0, %v27_v1  ;;  %v23_v5 = vld [vmem:[%s321_s1] sm:$0xff] }
   0x6   :  { %194 = vmatpush.xpose.msk.msra.mxu2 %vm52_vm0, %v27_v1  ;;  %195 = vmatpush.xpose.msk.msra.mxu3 %vm52_vm0, %v27_v1 }
   0x7   :  { %44 = vperm.xlu1 %199, %v30_v3   ;;  %34 = vperm.xlu0 %198, %v28_v4  }
   0x8   :  { %12 = vsyncpa [#allocation4], 0  ;;  %189 = vmatmul.msk.f32.vlgmr.msra.gmra.mxu0 %vm52_vm0, %v23_v5  ;;  %190 = vmatmul.msk.f32.vlgmr.msra.gmra.mxu1 %vm52_vm0, %v24_v6  ;;  %v101_v9 = vld [vmem:[%s323_s3] sm:$0xff]  ;;  %v31_v10 = vld [vmem:[%s322_s2 + $0x18] sm:$0xff]  ;;  %vm129_vm1 = vcmask 64512   ;;  %s179_s20 = sshll.u32 %s325_s5, 4  ;;  %s180_s20 = int_to_ptr.hbm [resolvable:$true] %s179_s20 }
   0x9   :  { %191 = vmatmul.msk.f32.vlgmr.msra.gmra.mxu2 %vm52_vm0, %v25_v7  ;;  %192 = vmatmul.msk.f32.vlgmr.msra.gmra.mxu3 %vm52_vm0, %v26_v8  ;;  %v29_v11 = vld [vmem:[%s322_s2 + $0x8] sm:$0xff]  ;;  %v104_v13 = vld [vmem:[%s323_s3 + $0x18] sm:$0xff]  ;;  %v103_v14 = vld [vmem:[%s323_s3 + $0x10] sm:$0xff]  ;;  %s232_s2 = smov [#allocation3]   ;;  %vm170_vm5 = vcmask 57344  }
   0xa   :  { %200 = vset.pattern.permute.xlu2 %v231_v2  ;;  %v102_v12 = vld [vmem:[%s323_s3 + $0x8] sm:$0xff]  ;;  %v143_v15 = vld [vmem:[#allocation2] sm:$0x1]  ;;  %s177_s3 = sshll.u32 %s232_s2, 4  ;;  %s178_s3 = int_to_ptr.vmem [resolvable:$true] %s177_s3 }
   0xb   :  { %107 = vperm.xlu2 %200, %v101_v9  }
   0xf   :  { %49 = vperm.xlu1 %199, %v31_v10   ;;  %39 = vperm.xlu0 %198, %v29_v11  }
  0x13   :  { %112 = vperm.xlu2 %200, %v102_v12  }
  0x17   :  { %122 = vperm.xlu1 %199, %v104_v13   ;;  %117 = vperm.xlu0 %198, %v103_v14  }
  0x1b   :  { %146 = vperm.xlu2 %200, %v143_v15  }
  0x65   :  { %v108_v18 = vpop.permute.xlu2 %107 }
  0x6d   :  { %v113_v27 = vpop.permute.xlu2 %112 }
  0x75   :  { %v147_v51 = vpop.permute.xlu2 %146 }
  0x76   :  { %v149_v53 = vperm.slane %v147_v51, 0 }
  0x79   :  { %v35_v16 = vpop.permute.xlu0 %34  ;;  %v45_v17 = vpop.permute.xlu1 %44 }
  0x81   :  { %v40_v19 = vpop.permute.xlu0 %39  ;;  %v50_v22 = vpop.permute.xlu1 %49 }
  0x85   :  { %v85_v20 = vpop.f32.mrf.mxu0  ;;  %v88_v21 = vpop.f32.mrf.mxu1 }
  0x86   :  { %v86_v23 = vadd.f32 %v85_v20, %v35_v16  ;;  %v89_v24 = vadd.f32 %v88_v21, %v40_v19 }
  0x88   :  { %v97_v25 = vmax.f32 %v86_v23, 0.0  ;;  %v98_v26 = vmax.f32 %v89_v24, 0.0 }
  0x89   :  { %v123_v38 = vpop.permute.xlu1 %122  ;;  %v118_v39 = vpop.permute.xlu0 %117 }
  0x8a   :  { %v125_v28 = vmul.f32 %v108_v18, %v97_v25  ;;  %v126_v29 = vmul.f32 %v113_v27, %v98_v26 }
  0x8c   :  { %v91_v30 = vpop.f32.mrf.mxu2  ;;  %v94_v31 = vpop.f32.mrf.mxu3  ;;  %v130_v34 = vsel %vm129_vm1, %v125_v28, 0.0  ;;  %v131_v35 = vsel %vm129_vm1, %v126_v29, 0.0 }
  0x8d   :  { %v92_v32 = vadd.f32 %v91_v30, %v45_v17  ;;  %v95_v33 = vadd.f32 %v94_v31, %v50_v22  ;;  %v132_v42 = vadd.f32 %v131_v35, %v130_v34 }
  0x8f   :  { %v99_v36 = vmax.f32 %v92_v32, 0.0  ;;  %v100_v37 = vmax.f32 %v95_v33, 0.0 }
  0x91   :  { %v127_v40 = vmul.f32 %v118_v39, %v99_v36  ;;  %v128_v41 = vmul.f32 %v123_v38, %v100_v37 }
  0x93   :  { %v133_v43 = vsel %vm129_vm1, %v127_v40, 0.0  ;;  %v135_v45 = vsel %vm129_vm1, %v128_v41, 0.0 }
  0x94   :  { %v134_v44 = vadd.f32 %v133_v43, %v132_v42 }
  0x96   :  { %v136_v46 = vadd.f32 %v135_v45, %v134_v44 }
  0x98   :  { %v137_v47 = vrot.slane %v136_v46, 4 }
  0x9a   :  { %v138_v48 = vadd.f32 %v137_v47, %v136_v46 }
  0x9c   :  { %v139_v49 = vrot.slane %v138_v48, 2 }
  0x9e   :  { %v140_v50 = vadd.f32 %v139_v49, %v138_v48 }
  0xa0   :  { %v141_v52 = vrot.slane %v140_v50, 1 }
  0xa2   :  { %v142_v54 = vadd.f32 %v141_v52, %v140_v50 }
  0xa4   :  { %v150_v55 = vadd.f32 %v149_v53, %v142_v54 }
  0xa6   :  { %v151_v56 = vsub.f32 0.0, %v150_v55 }
  0xa8   :  { %v152_v57 = vmul.f32 1.442695, %v151_v56 }
  0xaa   :  { %201 = vpow2.f32 %v152_v57 }
  0xb0   :  { %v202_v58 = vpop.eup %201 }
  0xb1   :  { %v154_v59 = vadd.f32 1.0, %v202_v58 }
  0xb3   :  { %203 = vrcp.f32 %v154_v59  ;;  %v166_v63 = vand.u32 2147483648, %v154_v59  ;;  %v164_v1 = vand.u32 2147483647, %v154_v59  ;;  %vm160_vm3 = vweird.f32 %v154_v59 }
  0xb5   :  { %v167_v3 = vor.u32 1.1754944e-38, %v166_v63  ;;  %vm165_vm6 = vcmp.eq.f32.partialorder %v164_v1, 8.507059e+37 }
  0xb9   :  { %v204_v60 = vpop.eup %203 }
  0xba   :  { %v156_v61 = vmul.f32 %v204_v60, %v154_v59  ;;  %vm161_vm2 = vweird.f32 %v204_v60 }
  0xbb   :  { %vm162_vm4 = vmor %vm160_vm3, %vm161_vm2 }
  0xbc   :  { %v157_v62 = vsub.f32 1.0, %v156_v61 }
  0xbe   :  { %v158_v0 = vmul.f32 %v204_v60, %v157_v62 }
  0xc0   :  { %v159_v2 = vadd.f32 %v204_v60, %v158_v0 }
  0xc2   :  { %v163_v4 = vsel %vm162_vm4, %v204_v60, %v159_v2 }
  0xc3   :  { %v168_v5 = vsel %vm165_vm6, %v167_v3, %v163_v4 }
  0xc4   :  { %171 = vst.msk [vmem:[#allocation3] sm:$0x1] %vm170_vm5, %v168_v5 }
  0xc5   :  { %182 = dma.vmem_to_hbm [thread:$0]  %s178_s3, 16, %s180_s20, [#allocation4]  }
  0xc6   :  { %229 = dma.done.wait [#allocation4], 16  }
  0xc7   :  { %230 = vsyncadd [#allocation4], 4294967280 }
  0xc8   :  { %187 = vsyncpa [#allocation4], 1 }

</bundles_post_ra>
